<compile_context>
chip_gen: v5e
topology: v5e:2x2
jax: 0.10.0
libtpu: 0.0.40
codegen_flags: <defaults>
</compile_context>

<pallas_src>
import functools

import jax
import jax.numpy as jnp
from jax.experimental import pallas as pl
from jax.experimental.pallas import tpu as pltpu

LOG_STD_MAX = 2.0
LOG_STD_MIN = -5.0

_SELU_ALPHA = 1.6732632423543772848170429916717
_SELU_SCALE = 1.0507009873554804934193349852946


def _round_up(x, m):
    return ((x + m - 1) // m) * m


def _cdiv(a, b):
    return (a + b - 1) // b


def _selu(x):
    # Matches torch.nn.functional.selu (computed in f32). NOTE: the unselected
    # branch evaluates exp(x) for large positive x; harmless for this forward
    # pass (the other branch is selected), but a naive autodiff would need a
    # safe-where.
    return _SELU_SCALE * jnp.where(x > 0, x, _SELU_ALPHA * (jnp.exp(x) - 1.0))


def _policy_kernel(state_ref, w1_ref, w2_ref, wh_ref, b_ref, out_ref):
    hidden = w2_ref.shape[1]
    head_out = wh_ref.shape[1]
    cd = w1_ref.dtype  # matmul operand dtype (f32 or bf16)

    # In-kernel operand cast (VPU op hidden under the DMA) instead of a
    # separate wrapper-side XLA pass over the state.
    x = state_ref[...].astype(cd)

    # Packed biases / clamp bounds (all f32):
    #   row 0 = b1, row 1 = b2, row 2 = [bm | bs],
    #   row 3 = clamp lo ([-inf for mean lanes | LOG_STD_MIN for log_std lanes]),
    #   row 4 = clamp hi ([+inf                | LOG_STD_MAX               ]).
    b1 = b_ref[0:1, :hidden]
    b2 = b_ref[1:2, :hidden]
    bh = b_ref[2:3, :head_out]
    lo = b_ref[3:4, :head_out]
    hi = b_ref[4:5, :head_out]

    # Hidden layers: Linear + SELU (MXU matmul, f32 accumulation, f32 epilogue).
    h1 = _selu(jnp.dot(x, w1_ref[...], preferred_element_type=jnp.float32) + b1)
    h2 = _selu(jnp.dot(h1.astype(cd), w2_ref[...],
                       preferred_element_type=jnp.float32) + b2)

    # Fused output heads: one matmul produces [mean | log_std] lanes; the
    # per-lane clamp bounds leave the mean lanes untouched (+-inf bounds).
    heads = jnp.dot(h2.astype(cd), wh_ref[...],
                    preferred_element_type=jnp.float32) + bh
    heads = jnp.clip(heads, lo, hi)

    out_ref[...] = heads.astype(out_ref.dtype)


def pack_params(params, compute_dtype=jnp.float32):
    """One-time param fusion: fused head weight, packed biases+clamp bounds."""
    hidden = params["w1"].shape[1]
    action_dim = params["wm"].shape[1]
    head_out = 2 * action_dim
    bias_w = _round_up(max(hidden, head_out), 128)

    # Fused head weight: [hidden, mean | log_std] (no lane padding -> narrow,
    # contiguous output writeback).
    wh = jnp.concatenate([params["wm"], params["ws"]], axis=1)

    b = jnp.zeros((5, bias_w), jnp.float32)
    b = b.at[0, :hidden].set(params["b1"][0])
    b = b.at[1, :hidden].set(params["b2"][0])
    b = b.at[2, :action_dim].set(params["bm"][0])
    b = b.at[2, action_dim:head_out].set(params["bs"][0])
    b = b.at[3, :].set(-jnp.inf)
    b = b.at[3, action_dim:head_out].set(LOG_STD_MIN)
    b = b.at[4, :].set(jnp.inf)
    b = b.at[4, action_dim:head_out].set(LOG_STD_MAX)

    return {
        "w1": params["w1"].astype(compute_dtype),
        "w2": params["w2"].astype(compute_dtype),
        "wh": wh.astype(compute_dtype),
        "b": b,  # biases + bounds stay f32 (epilogue is f32 on all chips)
    }


@functools.partial(jax.jit, static_argnames=("action_dim", "block_m"))
def gaussian_policy_forward(state, packed, *, action_dim, block_m=2048):
    """packed: output of pack_params(). Returns (mean, log_std)."""
    B, obs_dim = state.shape
    hidden = packed["w2"].shape[1]
    head_out = packed["wh"].shape[1]

    # Row tile: big to amortize the ~0.35us/step grid overhead, capped at
    # ~B/2 so v7x's two TensorCores both get >=1 "parallel" grid step, and
    # sublane-aligned to the state dtype (8 for f32, 16 for 16-bit state).
    sub = 16 if jnp.dtype(state.dtype).itemsize == 2 else 8
    block_m = max(_round_up(block_m, sub), sub)
    half = max(_round_up(_cdiv(B, 2), sub), sub)
    bm = min(block_m, half)
    # Ragged last block: OOB input reads are row-independent garbage, OOB
    # output writes are dropped -> no wrapper-side jnp.pad needed.
    grid = (_cdiv(B, bm),)

    itemsize = lambda a: jnp.dtype(a.dtype).itemsize
    cost = pl.CostEstimate(
        flops=2 * B * (obs_dim * hidden + hidden * hidden + hidden * head_out),
        transcendentals=2 * B * hidden,  # exp inside the two SELUs
        bytes_accessed=(state.size * itemsize(state)
                        + sum(packed[k].size * itemsize(packed[k])
                              for k in ("w1", "w2", "wh", "b"))
                        + B * head_out * 4),
    )

    out = pl.pallas_call(
        _policy_kernel,
        out_shape=jax.ShapeDtypeStruct((B, head_out), jnp.float32),
        grid=grid,
        in_specs=[
            pl.BlockSpec((bm, obs_dim), lambda i: (i, 0)),        # state: tiled over batch
            pl.BlockSpec((obs_dim, hidden), lambda i: (0, 0)),    # weights: VMEM-resident
            pl.BlockSpec((hidden, hidden), lambda i: (0, 0)),
            pl.BlockSpec((hidden, head_out), lambda i: (0, 0)),
            pl.BlockSpec(packed["b"].shape, lambda i: (0, 0)),
        ],
        out_specs=pl.BlockSpec((bm, head_out), lambda i: (i, 0)),
        compiler_params=pltpu.CompilerParams(
            dimension_semantics=("parallel",)),
        cost_estimate=cost,
    )(state, packed["w1"], packed["w2"], packed["wh"], packed["b"])

    mean = out[:, :action_dim]
    log_std = out[:, action_dim:]
    return mean, log_std


def _xavier_uniform(key, fan_in, fan_out, gain=1.0, dtype=jnp.float32):
    # Matches torch.nn.init.xavier_uniform_ on a (fan_out, fan_in) weight,
    # built directly as the transposed [fan_in, fan_out] array.
    bound = gain * (6.0 / (fan_in + fan_out)) ** 0.5
    return jax.random.uniform(key, (fan_in, fan_out), dtype=dtype,
                              minval=-bound, maxval=bound)


def init_params(key, observation_dim, action_dim, hidden_dim=32):
    k1, k2, k3, k4 = jax.random.split(key, 4)
    return {
        # linear1: obs -> hidden, xavier gain=1, bias=0
        "w1": _xavier_uniform(k1, observation_dim, hidden_dim, gain=1.0),
        "b1": jnp.zeros((1, hidden_dim), jnp.float32),
        # linear2: hidden -> hidden (resnet=False), xavier gain=1, bias=0
        "w2": _xavier_uniform(k2, hidden_dim, hidden_dim, gain=1.0),
        "b2": jnp.zeros((1, hidden_dim), jnp.float32),
        # mean head: xavier gain=0.001, bias=0
        "wm": _xavier_uniform(k3, hidden_dim, action_dim, gain=0.001),
        "bm": jnp.zeros((1, action_dim), jnp.float32),
        # log_std head: xavier gain=1, bias=0
        "ws": _xavier_uniform(k4, hidden_dim, action_dim, gain=1.0),
        "bs": jnp.zeros((1, action_dim), jnp.float32),
    }


def _reference_forward(state, params, compute_dtype=jnp.float32):
    # Pure-JAX reference with the same operand-dtype casting as the kernel.
    cd = compute_dtype

    def dot(a, b):
        return jnp.dot(a.astype(cd), b.astype(cd), preferred_element_type=jnp.float32)

    h1 = jax.nn.selu(dot(state, params["w1"]) + params["b1"])
    h2 = jax.nn.selu(dot(h1, params["w2"]) + params["b2"])
    mean = dot(h2, params["wm"]) + params["bm"]
    log_std = jnp.clip(dot(h2, params["ws"]) + params["bs"], LOG_STD_MIN, LOG_STD_MAX)
    return mean, log_std


if __name__ == "__main__":
    key = jax.random.PRNGKey(0)
    k_state, k_params, k_state2 = jax.random.split(key, 3)

    batch = 8
    observation_dim = 16
    action_dim = 8
    hidden_dim = 32

    state = jax.random.normal(k_state, (batch, observation_dim), jnp.float32)
    params = init_params(k_params, observation_dim, action_dim, hidden_dim)

    # f32 path: exact module semantics.
    packed_f32 = pack_params(params, jnp.float32)
    mean, log_std = gaussian_policy_forward(state, packed_f32, action_dim=action_dim)
    jax.block_until_ready((mean, log_std))

    ref_mean, ref_log_std = _reference_forward(state, params, jnp.float32)
    assert mean.shape == (batch, action_dim) and log_std.shape == (batch, action_dim)
    assert jnp.allclose(mean, ref_mean, atol=1e-5, rtol=1e-5)
    assert jnp.allclose(log_std, ref_log_std, atol=1e-5, rtol=1e-5)

    # Ragged batch (not a multiple of the row tile, nor of 8): exercises the
    # partial-last-block path (OOB reads garbage / OOB writes dropped) and a
    # 2-step grid for megacore sharding.
    batch2 = 300
    state2 = jax.random.normal(k_state2, (batch2, observation_dim), jnp.float32)
    mean2, log_std2 = gaussian_policy_forward(state2, packed_f32, action_dim=action_dim)
    jax.block_until_ready((mean2, log_std2))
    ref_mean2, ref_log_std2 = _reference_forward(state2, params, jnp.float32)
    assert mean2.shape == (batch2, action_dim)
    assert jnp.allclose(mean2, ref_mean2, atol=1e-5, rtol=1e-5)
    assert jnp.allclose(log_std2, ref_log_std2, atol=1e-5, rtol=1e-5)

    # bf16 operand path (bandwidth/VMEM mode): f32 accumulation + f32 epilogue.
    packed_bf16 = pack_params(params, jnp.bfloat16)
    mean_bf, log_std_bf = gaussian_policy_forward(state, packed_bf16, action_dim=action_dim)
    jax.block_until_ready((mean_bf, log_std_bf))
    ref_mean_bf, ref_log_std_bf = _reference_forward(state, params, jnp.bfloat16)
    assert jnp.allclose(mean_bf, ref_mean_bf, atol=2e-2, rtol=2e-2)
    assert jnp.allclose(log_std_bf, ref_log_std_bf, atol=2e-2, rtol=2e-2)

    print("KERNEL_OK")
</pallas_src>

<mosaic_0001>
module attributes {stable_mosaic.version = 11 : i64} {
  func.func @_policy_kernel(%arg0: i32, %arg1: memref<8x16xf32, #tpu.memory_space<vmem>>, %arg2: memref<16x32xf32, #tpu.memory_space<vmem>>, %arg3: memref<32x32xf32, #tpu.memory_space<vmem>>, %arg4: memref<32x16xf32, #tpu.memory_space<vmem>>, %arg5: memref<5x128xf32, #tpu.memory_space<vmem>>, %arg6: memref<8x16xf32, #tpu.memory_space<vmem>>) attributes {dimension_semantics = [#tpu.dimension_semantics<parallel>], iteration_bounds = array<i64: 1>, scalar_prefetch = 0 : i64, scratch_operands = 0 : i64, tpu.core_type = #tpu.core_type<tc>, window_params = [{transform_indices = @transform_0, window_bounds = array<i64: 8, 16>}, {pipeline_mode = #tpu.pipeline_mode<synchronous>, transform_indices = @transform_1, window_bounds = array<i64: 16, 32>}, {pipeline_mode = #tpu.pipeline_mode<synchronous>, transform_indices = @transform_2, window_bounds = array<i64: 32, 32>}, {pipeline_mode = #tpu.pipeline_mode<synchronous>, transform_indices = @transform_3, window_bounds = array<i64: 32, 16>}, {pipeline_mode = #tpu.pipeline_mode<synchronous>, transform_indices = @transform_4, window_bounds = array<i64: 5, 128>}, {transform_indices = @transform_5, window_bounds = array<i64: 8, 16>}]} {
    %c0 = arith.constant 0 : index
    %c0_0 = arith.constant 0 : index
    %0 = vector.load %arg1[%c0, %c0_0] : memref<8x16xf32, #tpu.memory_space<vmem>>, vector<8x16xf32>
    %c0_1 = arith.constant 0 : index
    %c0_2 = arith.constant 0 : index
    %1 = vector.load %arg5[%c0_1, %c0_2] : memref<5x128xf32, #tpu.memory_space<vmem>>, vector<1x32xf32>
    %c1 = arith.constant 1 : index
    %c0_3 = arith.constant 0 : index
    %2 = vector.load %arg5[%c1, %c0_3] : memref<5x128xf32, #tpu.memory_space<vmem>>, vector<1x32xf32>
    %c2 = arith.constant 2 : index
    %c0_4 = arith.constant 0 : index
    %3 = vector.load %arg5[%c2, %c0_4] : memref<5x128xf32, #tpu.memory_space<vmem>>, vector<1x16xf32>
    %c3 = arith.constant 3 : index
    %c0_5 = arith.constant 0 : index
    %4 = vector.load %arg5[%c3, %c0_5] : memref<5x128xf32, #tpu.memory_space<vmem>>, vector<1x16xf32>
    %c4 = arith.constant 4 : index
    %c0_6 = arith.constant 0 : index
    %5 = vector.load %arg5[%c4, %c0_6] : memref<5x128xf32, #tpu.memory_space<vmem>>, vector<1x16xf32>
    %c0_7 = arith.constant 0 : index
    %c0_8 = arith.constant 0 : index
    %6 = vector.load %arg2[%c0_7, %c0_8] : memref<16x32xf32, #tpu.memory_space<vmem>>, vector<16x32xf32>
    %cst = arith.constant dense<0.000000e+00> : vector<8x32xf32>
    %7 = tpu.matmul %0, %6, %cst {dimension_numbers = #tpu.dot_dimension_numbers<[1], [0], [0], [1], [0, 0, 1, 1], [], []>} : vector<8x16xf32>, vector<16x32xf32>, vector<8x32xf32> -> vector<8x32xf32>
    %8 = vector.broadcast %1 : vector<1x32xf32> to vector<8x32xf32>
    %9 = arith.addf %7, %8 : vector<8x32xf32>
    %cst_9 = arith.constant 0.000000e+00 : f32
    %10 = vector.broadcast %cst_9 : f32 to vector<8x32xf32>
    %11 = arith.cmpf ogt, %9, %10 : vector<8x32xf32>
    %12 = math.exp %9 : vector<8x32xf32>
    %cst_10 = arith.constant 1.000000e+00 : f32
    %13 = vector.broadcast %cst_10 : f32 to vector<8x32xf32>
    %14 = arith.subf %12, %13 : vector<8x32xf32>
    %cst_11 = arith.constant 1.67326319 : f32
    %15 = vector.broadcast %cst_11 : f32 to vector<8x32xf32>
    %16 = arith.mulf %15, %14 : vector<8x32xf32>
    %17 = arith.select %11, %9, %16 : vector<8x32xi1>, vector<8x32xf32>
    %cst_12 = arith.constant 1.05070102 : f32
    %18 = vector.broadcast %cst_12 : f32 to vector<8x32xf32>
    %19 = arith.mulf %18, %17 : vector<8x32xf32>
    %c0_13 = arith.constant 0 : index
    %c0_14 = arith.constant 0 : index
    %20 = vector.load %arg3[%c0_13, %c0_14] : memref<32x32xf32, #tpu.memory_space<vmem>>, vector<32x32xf32>
    %cst_15 = arith.constant dense<0.000000e+00> : vector<8x32xf32>
    %21 = tpu.matmul %19, %20, %cst_15 {dimension_numbers = #tpu.dot_dimension_numbers<[1], [0], [0], [1], [0, 0, 1, 1], [], []>} : vector<8x32xf32>, vector<32x32xf32>, vector<8x32xf32> -> vector<8x32xf32>
    %22 = vector.broadcast %2 : vector<1x32xf32> to vector<8x32xf32>
    %23 = arith.addf %21, %22 : vector<8x32xf32>
    %cst_16 = arith.constant 0.000000e+00 : f32
    %24 = vector.broadcast %cst_16 : f32 to vector<8x32xf32>
    %25 = arith.cmpf ogt, %23, %24 : vector<8x32xf32>
    %26 = math.exp %23 : vector<8x32xf32>
    %cst_17 = arith.constant 1.000000e+00 : f32
    %27 = vector.broadcast %cst_17 : f32 to vector<8x32xf32>
    %28 = arith.subf %26, %27 : vector<8x32xf32>
    %cst_18 = arith.constant 1.67326319 : f32
    %29 = vector.broadcast %cst_18 : f32 to vector<8x32xf32>
    %30 = arith.mulf %29, %28 : vector<8x32xf32>
    %31 = arith.select %25, %23, %30 : vector<8x32xi1>, vector<8x32xf32>
    %cst_19 = arith.constant 1.05070102 : f32
    %32 = vector.broadcast %cst_19 : f32 to vector<8x32xf32>
    %33 = arith.mulf %32, %31 : vector<8x32xf32>
    %c0_20 = arith.constant 0 : index
    %c0_21 = arith.constant 0 : index
    %34 = vector.load %arg4[%c0_20, %c0_21] : memref<32x16xf32, #tpu.memory_space<vmem>>, vector<32x16xf32>
    %cst_22 = arith.constant dense<0.000000e+00> : vector<8x16xf32>
    %35 = tpu.matmul %33, %34, %cst_22 {dimension_numbers = #tpu.dot_dimension_numbers<[1], [0], [0], [1], [0, 0, 1, 1], [], []>} : vector<8x32xf32>, vector<32x16xf32>, vector<8x16xf32> -> vector<8x16xf32>
    %36 = vector.broadcast %3 : vector<1x16xf32> to vector<8x16xf32>
    %37 = arith.addf %35, %36 : vector<8x16xf32>
    %38 = vector.broadcast %4 : vector<1x16xf32> to vector<8x16xf32>
    %39 = arith.maximumf %38, %37 : vector<8x16xf32>
    %40 = vector.broadcast %5 : vector<1x16xf32> to vector<8x16xf32>
    %41 = arith.minimumf %40, %39 : vector<8x16xf32>
    %c0_23 = arith.constant 0 : index
    %c0_24 = arith.constant 0 : index
    %42 = vector.load %arg6[%c0_23, %c0_24] : memref<8x16xf32, #tpu.memory_space<vmem>>, vector<8x16xf32>
    tpu.vector_store %arg6[%c0_23, %c0_24], %41 {strides = array<i32>} : memref<8x16xf32, #tpu.memory_space<vmem>>, vector<8x16xf32>,
    return
  }
  func.func @transform_0(%arg0: i32) -> (i32, i32) {
    %c0_i32 = arith.constant 0 : i32
    %c0_i32_0 = arith.constant 0 : i32
    return %arg0, %c0_i32 : i32, i32
  }
  func.func @transform_1(%arg0: i32) -> (i32, i32) {
    %c0_i32 = arith.constant 0 : i32
    %c0_i32_0 = arith.constant 0 : i32
    %c0_i32_1 = arith.constant 0 : i32
    return %c0_i32, %c0_i32_0 : i32, i32
  }
  func.func @transform_2(%arg0: i32) -> (i32, i32) {
    %c0_i32 = arith.constant 0 : i32
    %c0_i32_0 = arith.constant 0 : i32
    %c0_i32_1 = arith.constant 0 : i32
    return %c0_i32, %c0_i32_0 : i32, i32
  }
  func.func @transform_3(%arg0: i32) -> (i32, i32) {
    %c0_i32 = arith.constant 0 : i32
    %c0_i32_0 = arith.constant 0 : i32
    %c0_i32_1 = arith.constant 0 : i32
    return %c0_i32, %c0_i32_0 : i32, i32
  }
  func.func @transform_4(%arg0: i32) -> (i32, i32) {
    %c0_i32 = arith.constant 0 : i32
    %c0_i32_0 = arith.constant 0 : i32
    %c0_i32_1 = arith.constant 0 : i32
    return %c0_i32, %c0_i32_0 : i32, i32
  }
  func.func @transform_5(%arg0: i32) -> (i32, i32) {
    %c0_i32 = arith.constant 0 : i32
    %c0_i32_0 = arith.constant 0 : i32
    return %arg0, %c0_i32 : i32, i32
  }
}

</mosaic_0001>

<bundles_post_ra>
// kernel: gaussian_policy_forward.1
= control target key start
LH: loop header
LB: loop body
LE: loop exit
PB: predicated region body
PF: predicated region fallthrough
CT: control target
= control target key end

     0   :  { %10 = vsyncpa [#allocation3], 0  ;;  %s306_s0 = inlined_call_operand.hbm [shape: f32[8,16], index: 0, kind: input, shape index: {}]   ;;  %s307_s1 = inlined_call_operand.vmem [shape: f32[16,32], index: 1, kind: input, shape index: {}]   ;;  %s308_s2 = inlined_call_operand.vmem [shape: f32[32,32], index: 2, kind: input, shape index: {}]   ;;  %s309_s3 = inlined_call_operand.vmem [shape: f32[32,16], index: 3, kind: input, shape index: {}]   ;;  %s310_s4 = inlined_call_operand.hbm [shape: f32[5,128], index: 4, kind: input, shape index: {}]   ;;  %s311_s5 = inlined_call_operand.vmem [shape: f32[8,16], index: 5, kind: output, shape index: {}]  }
   0x1   :  { %s17_s20 = sshll.u32 %s306_s0, 4  ;;  %s18_s20 = int_to_ptr.hbm [resolvable:$true] %s17_s20 }
   0x2   :  { %11 = vsyncpa [#allocation5], 0  ;;  %s231_s21 = smov [#allocation2]   ;;  %s34_s25 = sshll.u32 %s310_s4, 4  ;;  %s35_s25 = int_to_ptr.hbm [resolvable:$true] %s34_s25 }
   0x3   :  { %s19_s22 = sshll.u32 %s231_s21, 4  ;;  %s232_s26 = smov [#allocation4]   ;;  %s20_s22 = int_to_ptr.vmem [resolvable:$true] %s19_s22 }
   0x4   :  { %22 = dma.hbm_to_vmem [thread:$0]  %s18_s20, 128, %s20_s22, [#allocation3]  }
   0x5   :  { %s36_s27 = sshll.u32 %s232_s26, 4  ;;  %s37_s27 = int_to_ptr.vmem [resolvable:$true] %s36_s27 }
   0x6   :  { %39 = dma.hbm_to_vmem [thread:$0]  %s35_s25, 128, %s37_s27, [#allocation5]  }
   0x7   :  { %227 = dma.done.wait [#allocation3], 128  }
   0x8   :  { %228 = vsyncadd [#allocation3], 4294967168 }
   0x9   :  { %229 = dma.done.wait [#allocation5], 128  }
   0xa   :  { %230 = vsyncadd [#allocation5], 4294967168  ;;  %v55_v0 = vld [vmem:[%s307_s1 + $0x8] sm:$0xff]  ;;  %v54_v1 = vld [vmem:[%s307_s1] sm:$0xff]  ;;  %vm57_vm0 = vcmask 130048   ;;  %vm93_vm2 = vcmask 261120  }
   0xb   :  { %75 = vmatpush.msra.mxu0 %v55_v0  ;;  %v48_v2 = vld [vmem:[#allocation2] sm:$0xff]  ;;  %v91_v3 = vld [vmem:[%s308_s2 + $0x18] sm:$0xff]  ;;  %v90_v4 = vld [vmem:[%s308_s2 + $0x10] sm:$0xff] }
   0xc   :  { %109 = vmatpush.msra.mxu1 %v91_v3  ;;  %v89_v5 = vld [vmem:[%s308_s2 + $0x8] sm:$0xff]  ;;  %v88_v6 = vld [vmem:[%s308_s2] sm:$0xff]  ;;  %v127_v16 = vld [vmem:[%s309_s3 + $0x18] sm:$0xff] }
   0xd   :  { %76 = vmatpush.msra.mxu0 %v54_v1  ;;  %v170_v7 = vld [vmem:[#allocation4] ss:$0 sm:$0xff]  ;;  %144 = vmatpush.msra.mxu2 %v127_v16  ;;  %v126_v17 = vld [vmem:[%s309_s3 + $0x10] sm:$0xff]  ;;  %v124_v19 = vld [vmem:[%s309_s3] sm:$0xff] }
   0xe   :  { %163 = vmatmul.msk.f32.vlgmr.msra.gmra.mxu0 %vm57_vm0, %v48_v2  ;;  %110 = vmatpush.msra.mxu1 %v90_v4  ;;  %v125_v18 = vld [vmem:[%s309_s3 + $0x8] sm:$0xff] }
   0xf   :  { %145 = vmatpush.msra.mxu2 %v126_v17  ;;  %v171_v20 = vld [vmem:[#allocation4 + $0x1] ss:$0 sm:$0xff]  ;;  %v172_v29 = vld [vmem:[#allocation4 + $0x2] ss:$0 sm:$0xff]  ;;  %v173_v30 = vld [vmem:[#allocation4 + $0x3] ss:$0 sm:$0xff] }
  0x10   :  { %111 = vmatpush.msra.mxu1 %v89_v5  ;;  %v174_v33 = vld [vmem:[#allocation4 + $0x4] ss:$0 sm:$0xff] }
  0x11   :  { %146 = vmatpush.msra.mxu2 %v125_v18 }
  0x12   :  { %112 = vmatpush.msra.mxu1 %v88_v6 }
  0x13   :  { %147 = vmatpush.msra.mxu2 %v124_v19 }
  0x8b   :  { %v78_v8 = vpop.f32.mrf.mxu0 }
  0x8c   :  { %v79_v9 = vadd.f32 %v170_v7, %v78_v8 }
  0x8e   :  { %v82_v10 = vmul.f32 1.442695, %v79_v9  ;;  %vm81_vm1 = vcmp.gt.f32.partialorder %v79_v9, 0.0 }
  0x90   :  { %175 = vpow2.f32 %v82_v10 }
  0x96   :  { %v176_v11 = vpop.eup %175 }
  0x97   :  { %v164_v12 = vadd.f32 -1.0, %v176_v11 }
  0x99   :  { %v85_v13 = vmul.f32 1.6732632, %v164_v12 }
  0x9b   :  { %v86_v14 = vsel %vm81_vm1, %v79_v9, %v85_v13 }
  0x9c   :  { %v87_v15 = vmul.f32 1.050701, %v86_v14 }
  0x9e   :  { %165 = vmatmul.msk.f32.vlgmr.msra.gmra.mxu1 %vm93_vm2, %v87_v15 }
 0x11b   :  { %v114_v21 = vpop.f32.mrf.mxu1 }
 0x11c   :  { %v115_v22 = vadd.f32 %v171_v20, %v114_v21 }
 0x11e   :  { %v118_v23 = vmul.f32 1.442695, %v115_v22  ;;  %vm117_vm3 = vcmp.gt.f32.partialorder %v115_v22, 0.0 }
 0x120   :  { %177 = vpow2.f32 %v118_v23 }
 0x126   :  { %v178_v24 = vpop.eup %177 }
 0x127   :  { %v166_v25 = vadd.f32 -1.0, %v178_v24 }
 0x129   :  { %v121_v26 = vmul.f32 1.6732632, %v166_v25 }
 0x12b   :  { %v122_v27 = vsel %vm117_vm3, %v115_v22, %v121_v26 }
 0x12c   :  { %v123_v28 = vmul.f32 1.050701, %v122_v27 }
 0x12e   :  { %167 = vmatmul.msk.f32.vlgmr.msra.gmra.mxu2 %vm93_vm2, %v123_v28 }
 0x1b1   :  { %v149_v31 = vpop.f32.mrf.mxu2 }
 0x1b2   :  { %v150_v32 = vadd.f32 %v172_v29, %v149_v31 }
 0x1b4   :  { %v153_v34 = vmax.f32 %v173_v30, %v150_v32 }
 0x1b6   :  { %v155_v35 = vmin.f32 %v174_v33, %v153_v34 }
 0x1b8   :  { %156 = vst.msk [vmem:[%s311_s5] sm:$0xff] %vm57_vm0, %v155_v35 }
 0x1b9   :  { %161 = vsyncpa [#allocation3], 1 }
 0x1ba   :  { %162 = vsyncpa [#allocation5], 1 }

</bundles_post_ra>
